<compile_context>
chip_gen: v5e
topology: v5e:2x2
jax: 0.10.0
libtpu: 0.0.40
codegen_flags: <defaults>
</compile_context>

<pallas_src>
import math
import jax
import jax.numpy as jnp
from jax.experimental import pallas as pl
from jax.experimental.pallas import tpu as pltpu


def _round_up(x: int, m: int) -> int:
    return ((x + m - 1) // m) * m


def _vmem_limit_bytes() -> int:
    """Generation-aware scoped-VMEM limit (v5e/v6e: 96 MiB, v7x: ~48 MiB)."""
    cap = 64 * 1024 * 1024
    try:
        cap = int(pltpu.get_tpu_info().vmem_capacity_bytes)
    except Exception:
        pass
    return min((cap * 3) // 4, 96 * 1024 * 1024)


def _pick_tm(n: int, row_bytes: int, avail_bytes: int, *,
             target_bytes: int = 2 * 1024 * 1024, tm_cap: int = 2048) -> int:
    """Rows per grid step.

    Targets ~2 MiB of streamed (delta + output) bytes per step so the ~0.35 us
    per-step overhead is amortized; keeps the 2x-buffered streaming tiles within
    `avail_bytes`; keeps >= 2 row tiles when splitting is worthwhile (v7x 2 TCs).
    """
    row_bytes = max(1, row_bytes)
    tm = max(8, _round_up(max(1, target_bytes // row_bytes), 8))
    tm = min(tm, tm_cap)
    tm = min(tm, _round_up(n, 8))
    if n * row_bytes >= 2 * target_bytes:            # big enough to split across TCs
        tm = min(tm, max(8, _round_up((n + 1) // 2, 8)))
    while tm > 8 and 2 * tm * row_bytes > max(avail_bytes, 1):
        tm = max(8, _round_up(tm // 2, 8))
    return tm


# ---------------------------------------------------------------------------
# Kernels
# ---------------------------------------------------------------------------

def _td_matmul_kernel(d_ref, wt_ref, b_ref, o_ref):
    # d_ref : (TM, K)   delta row tile (resident across the O-tile axis)
    # wt_ref: (K, TN)   pre-transposed, pre-negated weights
    # b_ref : (1, TN)   pre-negated bias
    # o_ref : (TM, TN)
    z = jnp.dot(d_ref[...], wt_ref[...], preferred_element_type=jnp.float32)
    z = z + b_ref[...]
    # exp(-relu(out)) == exp(min(-out, 0)); negation folded into W/b.
    o_ref[...] = jnp.exp(jnp.minimum(z, 0.0)).astype(o_ref.dtype)


def _td_diag_kernel(d_ref, wd_ref, b_ref, o_ref):
    # d_ref : (TM, C)   delta row tile (lane-packed to C=128 when possible)
    # wd_ref: (1, C)    -diag(W) (tiled across lanes when packed)
    # b_ref : (1, C)    -b
    # o_ref : (TM, C)
    z = d_ref[...].astype(jnp.float32) * wd_ref[...] + b_ref[...]
    o_ref[...] = jnp.exp(jnp.minimum(z, 0.0)).astype(o_ref.dtype)


# ---------------------------------------------------------------------------
# Weight preprocessing (hoistable across calls)
# ---------------------------------------------------------------------------

def prepare_params(W, b, *, diag=False, compute_dtype=None):
    """Precompute the negated (and transposed) weights once; reuse across calls."""
    bn = (-b).astype(jnp.float32).reshape(1, -1)
    if diag:
        wn = (-jnp.diagonal(W)).astype(jnp.float32).reshape(1, -1)      # (1, K)
    else:
        wdt = compute_dtype if compute_dtype is not None else jnp.float32
        wn = (-W).astype(jnp.float32).T.astype(wdt)                     # (K, O)
    return wn, bn


# ---------------------------------------------------------------------------
# Wrapper
# ---------------------------------------------------------------------------

def temporal_decay(delta, W=None, b=None, diag=False, *,
                   compute_dtype=None, prepared=None):
    """Pallas equivalent of TemporalDecay.forward.

    delta: (..., input_size); W: (output_size, input_size); b: (output_size,).
    compute_dtype=jnp.bfloat16 enables the bf16 MXU path (f32 accumulation) as a
    tolerance trade-off; default None keeps exact f32 semantics.
    Pass prepared=prepare_params(...) to hoist weight preprocessing out of a loop.
    """
    if prepared is None:
        prepared = prepare_params(W, b, diag=diag, compute_dtype=compute_dtype)
    wn, bn = prepared

    out_dtype = delta.dtype
    lead_shape = delta.shape[:-1]
    input_size = delta.shape[-1]
    n = int(math.prod(lead_shape))

    vmem_limit = _vmem_limit_bytes()
    usable = int(vmem_limit * 0.85)          # headroom for compiler-internal scratch

    # ------------------------------------------------------------------ diag
    if diag:
        assert wn.shape[-1] == input_size, "diag=True requires a square W"
        d2 = delta.reshape(n, input_size)

        total = n * input_size
        if input_size < 128 and 128 % input_size == 0 and total % 128 == 0:
            # Lane-pack: metadata-only reshape (row-major contiguous) -> 128 lanes.
            reps = 128 // input_size
            d_k = d2.reshape(total // 128, 128)
            w_k = jnp.tile(wn, (1, reps))
            b_k = jnp.tile(bn, (1, reps))
        else:
            d_k, w_k, b_k = d2, wn, bn

        rows, cols = d_k.shape
        elt = jnp.dtype(out_dtype).itemsize
        row_bytes = cols * (jnp.dtype(d_k.dtype).itemsize + elt)
        resident = 2 * (int(w_k.size) + int(b_k.size)) * 4   # 2x: default double-buffer
        tm = _pick_tm(rows, row_bytes, usable - resident)

        out = pl.pallas_call(
            _td_diag_kernel,
            out_shape=jax.ShapeDtypeStruct((rows, cols), out_dtype),
            grid=(pl.cdiv(rows, tm),),
            in_specs=[
                pl.BlockSpec((tm, cols), lambda i: (i, 0)),   # streamed row tiles
                pl.BlockSpec((1, cols), lambda i: (0, 0)),    # resident -diag(W)
                pl.BlockSpec((1, cols), lambda i: (0, 0)),    # resident -b
            ],
            out_specs=pl.BlockSpec((tm, cols), lambda i: (i, 0)),
            compiler_params=pltpu.CompilerParams(
                dimension_semantics=("parallel",),
                vmem_limit_bytes=vmem_limit,
            ),
            cost_estimate=pl.CostEstimate(
                flops=2 * total,
                transcendentals=total,
                bytes_accessed=2 * total * elt + 8 * cols,
            ),
        )(d_k, w_k, b_k)

        return out.reshape(*lead_shape, input_size)

    # ---------------------------------------------------------------- matmul
    K, O = wn.shape
    assert K == input_size, "delta feature dim must match W's input_size"
    d2 = delta.reshape(n, input_size)
    if compute_dtype is not None:
        d2 = d2.astype(compute_dtype)
        wn = wn.astype(compute_dtype)

    d_elt = jnp.dtype(d2.dtype).itemsize
    w_elt = jnp.dtype(wn.dtype).itemsize
    o_elt = jnp.dtype(out_dtype).itemsize

    # Tile the output columns only when the (double-buffered) resident weight
    # block would not comfortably fit VMEM (matters on v7x's 64 MiB).
    if 2 * K * O * w_elt <= usable // 2:
        tn = O
    else:
        tn = ((usable // 2) // (2 * K * w_elt)) // 128 * 128
        tn = max(128, min(tn, _round_up(O, 128)))
    n_j = pl.cdiv(O, tn)

    resident = 2 * (K * tn * w_elt + tn * 4)        # weights + bias, double-buffered
    row_bytes = K * d_elt + tn * o_elt
    tm = _pick_tm(n, row_bytes, usable - resident)
    n_i = pl.cdiv(n, tm)

    out = pl.pallas_call(
        _td_matmul_kernel,
        out_shape=jax.ShapeDtypeStruct((n, O), out_dtype),
        grid=(n_i, n_j),
        in_specs=[
            pl.BlockSpec((tm, K), lambda i, j: (i, 0)),   # rows; resident across j
            pl.BlockSpec((K, tn), lambda i, j: (0, j)),   # -W^T tile (fully resident if n_j==1)
            pl.BlockSpec((1, tn), lambda i, j: (0, j)),   # -b tile
        ],
        out_specs=pl.BlockSpec((tm, tn), lambda i, j: (i, j)),
        compiler_params=pltpu.CompilerParams(
            dimension_semantics=("parallel", "parallel"),
            vmem_limit_bytes=vmem_limit,
        ),
        cost_estimate=pl.CostEstimate(
            flops=2 * n * K * O,
            transcendentals=n * O,
            bytes_accessed=n * K * d_elt + K * O * w_elt + O * 4 + n * O * o_elt,
        ),
    )(d2, wn, bn)

    return out.reshape(*lead_shape, O)


def init_params(key, input_size, output_size, dtype=jnp.float32):
    # Matches reset_parameters(): uniform(-std, std), std = 1/sqrt(output_size)
    std = 1.0 / math.sqrt(output_size)
    kw, kb = jax.random.split(key)
    W = jax.random.uniform(kw, (output_size, input_size), dtype=dtype,
                           minval=-std, maxval=std)
    b = jax.random.uniform(kb, (output_size,), dtype=dtype,
                           minval=-std, maxval=std)
    return W, b


if __name__ == "__main__":
    key = jax.random.PRNGKey(0)
    k_delta, k_params = jax.random.split(key)
    k_extra = jax.random.fold_in(key, 1)

    batch, seq, input_size, output_size = 2, 8, 32, 32

    # Δ: time-gap tensor, shape (batch, seq, input_size)
    delta = jax.random.uniform(k_delta, (batch, seq, input_size),
                               dtype=jnp.float32, minval=0.0, maxval=5.0)
    W, b = init_params(k_params, input_size, output_size)

    ref = jnp.exp(-jnp.maximum(jnp.einsum("bsi,oi->bso", delta, W) + b, 0.0))
    ref_diag = jnp.exp(-jnp.maximum(delta * jnp.diagonal(W) + b, 0.0))

    # diag=False path (full linear, exact f32)
    gamma = jax.block_until_ready(temporal_decay(delta, W, b, diag=False))
    assert gamma.shape == (batch, seq, output_size)
    assert jnp.allclose(gamma, ref, atol=1e-5, rtol=1e-5)

    # diag=True path (lane-packed elementwise kernel)
    gamma_diag = jax.block_until_ready(temporal_decay(delta, W, b, diag=True))
    assert gamma_diag.shape == (batch, seq, output_size)
    assert jnp.allclose(gamma_diag, ref_diag, atol=1e-5, rtol=1e-5)

    # hoisted (prepared) weights — same result, preprocessing done once
    prep = prepare_params(W, b, diag=True)
    gamma_prep = jax.block_until_ready(temporal_decay(delta, diag=True, prepared=prep))
    assert jnp.allclose(gamma_prep, ref_diag, atol=1e-5, rtol=1e-5)

    # ragged row count (exercises pl.cdiv grid + masked edge block — no pad/slice)
    delta_r = jax.random.uniform(k_extra, (3, 5, input_size),
                                 dtype=jnp.float32, minval=0.0, maxval=5.0)
    ref_r = jnp.exp(-jnp.maximum(jnp.einsum("bsi,oi->bso", delta_r, W) + b, 0.0))
    ref_rd = jnp.exp(-jnp.maximum(delta_r * jnp.diagonal(W) + b, 0.0))
    g_r = jax.block_until_ready(temporal_decay(delta_r, W, b, diag=False))
    g_rd = jax.block_until_ready(temporal_decay(delta_r, W, b, diag=True))
    assert jnp.allclose(g_r, ref_r, atol=1e-5, rtol=1e-5)
    assert jnp.allclose(g_rd, ref_rd, atol=1e-5, rtol=1e-5)

    # optional bf16 MXU path (halved HBM traffic; looser tolerance trade-off)
    g_bf16 = jax.block_until_ready(
        temporal_decay(delta, W, b, diag=False, compute_dtype=jnp.bfloat16))
    assert jnp.allclose(g_bf16, ref, atol=5e-2, rtol=5e-2)

    print("KERNEL_OK")
</pallas_src>

<mosaic_0001>
module attributes {stable_mosaic.version = 11 : i64} {
  func.func @_td_matmul_kernel(%arg0: i32, %arg1: i32, %arg2: memref<16x32xf32, #tpu.memory_space<vmem>>, %arg3: memref<32x32xf32, #tpu.memory_space<vmem>>, %arg4: memref<1x32xf32, #tpu.memory_space<vmem>>, %arg5: memref<16x32xf32, #tpu.memory_space<vmem>>) attributes {dimension_semantics = [#tpu.dimension_semantics<parallel>, #tpu.dimension_semantics<parallel>], iteration_bounds = array<i64: 1, 1>, scalar_prefetch = 0 : i64, scratch_operands = 0 : i64, tpu.core_type = #tpu.core_type<tc>, window_params = [{transform_indices = @transform_0, window_bounds = array<i64: 16, 32>}, {transform_indices = @transform_1, window_bounds = array<i64: 32, 32>}, {transform_indices = @transform_2, window_bounds = array<i64: 1, 32>}, {transform_indices = @transform_3, window_bounds = array<i64: 16, 32>}]} {
    %c0 = arith.constant 0 : index
    %c0_0 = arith.constant 0 : index
    %0 = vector.load %arg2[%c0, %c0_0] : memref<16x32xf32, #tpu.memory_space<vmem>>, vector<16x32xf32>
    %c0_1 = arith.constant 0 : index
    %c0_2 = arith.constant 0 : index
    %1 = vector.load %arg3[%c0_1, %c0_2] : memref<32x32xf32, #tpu.memory_space<vmem>>, vector<32x32xf32>
    %cst = arith.constant dense<0.000000e+00> : vector<16x32xf32>
    %2 = tpu.matmul %0, %1, %cst {dimension_numbers = #tpu.dot_dimension_numbers<[1], [0], [0], [1], [0, 0, 1, 1], [], []>} : vector<16x32xf32>, vector<32x32xf32>, vector<16x32xf32> -> vector<16x32xf32>
    %c0_3 = arith.constant 0 : index
    %c0_4 = arith.constant 0 : index
    %3 = vector.load %arg4[%c0_3, %c0_4] : memref<1x32xf32, #tpu.memory_space<vmem>>, vector<1x32xf32>
    %4 = vector.broadcast %3 : vector<1x32xf32> to vector<16x32xf32>
    %5 = arith.addf %2, %4 : vector<16x32xf32>
    %cst_5 = arith.constant 0.000000e+00 : f32
    %6 = vector.broadcast %cst_5 : f32 to vector<16x32xf32>
    %7 = arith.minimumf %5, %6 : vector<16x32xf32>
    %8 = math.exp %7 : vector<16x32xf32>
    %c0_6 = arith.constant 0 : index
    %c0_7 = arith.constant 0 : index
    %9 = vector.load %arg5[%c0_6, %c0_7] : memref<16x32xf32, #tpu.memory_space<vmem>>, vector<16x32xf32>
    tpu.vector_store %arg5[%c0_6, %c0_7], %8 {strides = array<i32>} : memref<16x32xf32, #tpu.memory_space<vmem>>, vector<16x32xf32>,
    return
  }
  func.func @transform_0(%arg0: i32, %arg1: i32) -> (i32, i32) {
    %c0_i32 = arith.constant 0 : i32
    %c0_i32_0 = arith.constant 0 : i32
    return %arg0, %c0_i32 : i32, i32
  }
  func.func @transform_1(%arg0: i32, %arg1: i32) -> (i32, i32) {
    %c0_i32 = arith.constant 0 : i32
    %c0_i32_0 = arith.constant 0 : i32
    return %c0_i32, %arg1 : i32, i32
  }
  func.func @transform_2(%arg0: i32, %arg1: i32) -> (i32, i32) {
    %c0_i32 = arith.constant 0 : i32
    %c0_i32_0 = arith.constant 0 : i32
    return %c0_i32, %arg1 : i32, i32
  }
  func.func @transform_3(%arg0: i32, %arg1: i32) -> (i32, i32) {
    %c0_i32 = arith.constant 0 : i32
    return %arg0, %arg1 : i32, i32
  }
}

</mosaic_0001>

<bundles_post_ra>
// kernel: tpu_custom_call.1
= control target key start
LH: loop header
LB: loop body
LE: loop exit
PB: predicated region body
PF: predicated region fallthrough
CT: control target
= control target key end

     0   :  { %8 = vsyncpa [#allocation3], 0  ;;  %s259_s0 = inlined_call_operand.hbm [shape: f32[16,32], index: 0, kind: input, shape index: {}]   ;;  %s260_s1 = inlined_call_operand.hbm [shape: f32[32,32], index: 1, kind: input, shape index: {}]   ;;  %s261_s2 = inlined_call_operand.vmem [shape: f32[1,32], index: 2, kind: input, shape index: {}]   ;;  %s262_s3 = inlined_call_operand.hbm [shape: f32[16,32], index: 3, kind: output, shape index: {}]  }
   0x1   :  { %9 = vsyncpa [#allocation6], 0 }
   0x2   :  { %10 = vsyncpa [#allocation4], 0  ;;  %s15_s14 = sshll.u32 %s259_s0, 4  ;;  %s209_s15 = smov [#allocation2]   ;;  %s16_s14 = int_to_ptr.hbm [resolvable:$true] %s15_s14 }
   0x3   :  { %s17_s16 = sshll.u32 %s209_s15, 4  ;;  %s28_s19 = sshll.u32 %s260_s1, 4  ;;  %s18_s16 = int_to_ptr.vmem [resolvable:$true] %s17_s16  ;;  %s29_s19 = int_to_ptr.hbm [resolvable:$true] %s28_s19 }
   0x4   :  { %s210_s20 = smov 128   ;;  %s211_s21 = smov 8  }
   0x5   :  { %23 = dma.hbm_to_vmem [thread:$0]  %s16_s14, 256, %s18_s16, [#allocation3], %s210_s20, %s210_s20, %s211_s21  }
   0x6   :  { %s212_s22 = smov [#allocation5]  }
   0x7   :  { %s30_s23 = sshll.u32 %s212_s22, 4  ;;  %s31_s23 = int_to_ptr.vmem [resolvable:$true] %s30_s23 }
   0x8   :  { %36 = dma.hbm_to_vmem [thread:$0]  %s29_s19, 512, %s31_s23, [#allocation6], %s210_s20, %s210_s20, %s211_s21  }
   0x9   :  { %203 = dma.done.wait [#allocation3], 256  }
   0xa   :  { %204 = vsyncadd [#allocation3], 4294967040 }
   0xb   :  { %205 = dma.done.wait [#allocation6], 512  }
   0xc   :  { %206 = vsyncadd [#allocation6], 4294966784  ;;  %v52_v0 = vld [vmem:[#allocation5 + $0x18] sm:$0xff]  ;;  %v51_v1 = vld [vmem:[#allocation5 + $0x10] sm:$0xff]  ;;  %vm57_vm0 = vcmask 261120   ;;  %s213_s24 = smov [#allocation7]  }
   0xd   :  { %76 = vmatpush.msra.mxu0 %v52_v0  ;;  %117 = vmatpush.msra.mxu1 %v52_v0  ;;  %v50_v2 = vld [vmem:[#allocation5 + $0x8] sm:$0xff]  ;;  %v49_v3 = vld [vmem:[#allocation5] sm:$0xff]  ;;  %v47_v4 = vld [vmem:[#allocation2] sm:$0xff]  ;;  %s99_s25 = sshll.u32 %s213_s24, 4  ;;  %s101_s28 = sshll.u32 %s262_s3, 4  ;;  %s100_s25 = int_to_ptr.vmem [resolvable:$true] %s99_s25  ;;  %s102_s28 = int_to_ptr.hbm [resolvable:$true] %s101_s28 }
   0xe   :  { %v48_v5 = vld [vmem:[#allocation2 + $0x8] sm:$0xff]  ;;  %v126_v6 = vld [vmem:[%s261_s2] ss:$0 sm:$0xff] }
   0xf   :  { %77 = vmatpush.msra.mxu0 %v51_v1  ;;  %118 = vmatpush.msra.mxu1 %v51_v1 }
  0x11   :  { %78 = vmatpush.msra.mxu0 %v50_v2  ;;  %119 = vmatpush.msra.mxu1 %v50_v2 }
  0x13   :  { %79 = vmatpush.msra.mxu0 %v49_v3  ;;  %120 = vmatpush.msra.mxu1 %v49_v3 }
  0x14   :  { %115 = vmatmul.msk.f32.vlgmr.msra.gmra.mxu0 %vm57_vm0, %v47_v4  ;;  %116 = vmatmul.msk.f32.vlgmr.msra.gmra.mxu1 %vm57_vm0, %v48_v5 }
  0x91   :  { %v81_v7 = vpop.f32.mrf.mxu0  ;;  %v84_v8 = vpop.f32.mrf.mxu1 }
  0x92   :  { %v82_v9 = vadd.f32 %v126_v6, %v81_v7  ;;  %v85_v10 = vadd.f32 %v126_v6, %v84_v8 }
  0x94   :  { %v87_v11 = vmin.f32 %v82_v9, 0.0  ;;  %v88_v12 = vmin.f32 %v85_v10, 0.0 }
  0x96   :  { %v89_v13 = vmul.f32 1.442695, %v87_v11  ;;  %v91_v14 = vmul.f32 1.442695, %v88_v12 }
  0x98   :  { %127 = vpow2.f32 %v89_v13 }
  0x99   :  { %129 = vpow2.f32 %v91_v14 }
  0x9e   :  { %v128_v15 = vpop.eup %127 }
  0x9f   :  { %v130_v16 = vpop.eup %129  ;;  %93 = vst.msk [vmem:[#allocation7] sm:$0xff] %vm57_vm0, %v128_v15 }
  0xa0   :  { %94 = vst.msk [vmem:[#allocation7 + $0x8] sm:$0xff] %vm57_vm0, %v130_v16 }
  0xa1   :  { %107 = dma.vmem_to_hbm [thread:$0]  %s100_s25, 256, %s102_s28, [#allocation4], %s210_s20, %s210_s20, %s211_s21  }
  0xa2   :  { %207 = dma.done.wait [#allocation4], 256  }
  0xa3   :  { %208 = vsyncadd [#allocation4], 4294967040 }
  0xa4   :  { %112 = vsyncpa [#allocation3], 1 }
  0xa5   :  { %113 = vsyncpa [#allocation6], 1 }
  0xa6   :  { %114 = vsyncpa [#allocation4], 1 }

</bundles_post_ra>
